<compile_context>
chip_gen: v7x
topology: tpu7x:2x2x1
jax: 0.10.0
libtpu: 0.0.40
codegen_flags: <defaults>
</compile_context>

<pallas_src>
import jax
import jax.numpy as jnp
from jax.experimental import pallas as pl
from jax.experimental.pallas import tpu as pltpu


def _conv1x1_relu_kernel(x_ref, w_ref, b_ref, o_ref):
    # x_ref: (Cin,  TP) VMEM -- TP padded pixels on the lane axis (128-aligned)
    # w_ref: (Cout, Cin) VMEM -- one vreg worth of weights
    # b_ref: (Cout, 1)   VMEM -- bias column
    # o_ref: (Cout, TP)  VMEM
    cin = x_ref.shape[0]
    # Sublane-dense accumulator: (Cout, TP).  Bias folded into the init.
    acc = b_ref[...] + w_ref[:, 0:1] * x_ref[0:1, :]
    for ci in range(1, cin):                      # static, fully unrolled (3)
        acc = acc + w_ref[:, ci:ci + 1] * x_ref[ci:ci + 1, :]
    # Single full-tile, unmasked store.
    o_ref[...] = jnp.maximum(acc, 0.0)


def conv1x1_relu_pallas(x_nchw, weight, bias, *, lane_chunks=2):
    """relu(Conv2d(Cin->Cout, kernel=1, stride=1, padding=1)(x)).

    x_nchw: (N, Cin, H, W) float32
    weight: (Cout, Cin, 1, 1) float32
    bias:   (Cout,) float32
    returns: (N, Cout, H+2, W+2) float32
    """
    n, cin, h, w = x_nchw.shape
    cout = weight.shape[0]
    hp, wp = h + 2, w + 2
    p = hp * wp

    # Per-chunk lane width: multiple of 128 so every store is a full vst and
    # the pixel axis splits evenly across `lane_chunks` parallel grid steps.
    tp = pl.cdiv(p, 128 * lane_chunks) * 128
    p_pad = tp * lane_chunks

    # padding=1 with a 1x1 kernel == zero-pad the input spatially; the border
    # pixels then come out as relu(bias) inside the kernel automatically.
    x_pad = jnp.pad(x_nchw, ((0, 0), (0, 0), (1, 1), (1, 1)))
    x_flat = x_pad.reshape(n, cin, p)
    x_flat = jnp.pad(x_flat, ((0, 0), (0, 0), (0, p_pad - p)))

    w_mat = weight.reshape(cout, cin).astype(jnp.float32)   # (Cout, Cin)
    b_col = bias.reshape(cout, 1).astype(jnp.float32)       # (Cout, 1)

    out_flat = pl.pallas_call(
        _conv1x1_relu_kernel,
        out_shape=jax.ShapeDtypeStruct((n, cout, p_pad), jnp.float32),
        grid=(n, lane_chunks),
        in_specs=[
            pl.BlockSpec((None, cin, tp), lambda i, j: (i, 0, j)),
            pl.BlockSpec(memory_space=pltpu.MemorySpace.VMEM),
            pl.BlockSpec(memory_space=pltpu.MemorySpace.VMEM),
        ],
        out_specs=pl.BlockSpec((None, cout, tp), lambda i, j: (i, 0, j)),
        compiler_params=pltpu.CompilerParams(
            dimension_semantics=("parallel", "parallel")),
    )(x_flat, w_mat, b_col)

    # Drop the lane-alignment tail, then free reshape to (N, Cout, H+2, W+2).
    return out_flat[:, :, :p].reshape(n, cout, hp, wp)


def reference_jax(x_nchw, weight, bias):
    """Pure-JAX reference: relu(conv2d(x, weight, bias, stride=1, pad=1))."""
    y = jax.lax.conv_general_dilated(
        x_nchw, weight,
        window_strides=(1, 1),
        padding=((1, 1), (1, 1)),
        dimension_numbers=("NCHW", "OIHW", "NCHW"),
    )
    return jnp.maximum(y + bias[None, :, None, None], 0.0)


if __name__ == "__main__":
    key = jax.random.PRNGKey(0)
    k_x, k_w1, k_b1 = jax.random.split(key, 3)

    # Input consistent with the module: (1, 3, 64, 64), NCHW.
    x1 = jax.random.normal(k_x, (1, 3, 64, 64), dtype=jnp.float32)

    # conv1 parameters: Conv2d(3, 8, kernel_size=1)
    w1 = jax.random.normal(k_w1, (8, 3, 1, 1), dtype=jnp.float32) * 0.1
    b1 = jax.random.normal(k_b1, (8,), dtype=jnp.float32) * 0.1

    # conv2 parameters exist in __init__ but feed only the dead/invalid branch.
    _w2 = jax.random.normal(jax.random.PRNGKey(1), (8, 3, 1, 1),
                            dtype=jnp.float32) * 0.1
    _b2 = jnp.zeros((8,), dtype=jnp.float32)

    out = jax.block_until_ready(conv1x1_relu_pallas(x1, w1, b1))
    ref = jax.block_until_ready(reference_jax(x1, w1, b1))

    assert out.shape == (1, 8, 66, 66), out.shape
    assert jnp.allclose(out, ref, atol=1e-5, rtol=1e-5), "mismatch vs reference"

    print("KERNEL_OK")
</pallas_src>

<mosaic_0001>
module attributes {stable_mosaic.version = 11 : i64} {
  func.func @_conv1x1_relu_kernel(%arg0: i32, %arg1: i32, %arg2: memref<1x3x2304xf32, #tpu.memory_space<vmem>>, %arg3: memref<8x3xf32, #tpu.memory_space<vmem>>, %arg4: memref<8x1xf32, #tpu.memory_space<vmem>>, %arg5: memref<1x8x2304xf32, #tpu.memory_space<vmem>>) attributes {dimension_semantics = [#tpu.dimension_semantics<parallel>, #tpu.dimension_semantics<parallel>], iteration_bounds = array<i64: 1, 2>, scalar_prefetch = 0 : i64, scratch_operands = 0 : i64, tpu.core_type = #tpu.core_type<tc>, window_params = [{transform_indices = @transform_0, window_bounds = array<i64: 1, 3, 2304>}, {pipeline_mode = #tpu.pipeline_mode<synchronous>, transform_indices = @transform_1, window_bounds = array<i64: 8, 3>}, {pipeline_mode = #tpu.pipeline_mode<synchronous>, transform_indices = @transform_2, window_bounds = array<i64: 8, 1>}, {transform_indices = @transform_3, window_bounds = array<i64: 1, 8, 2304>}]} {
    %c0 = arith.constant 0 : index
    %c0_0 = arith.constant 0 : index
    %0 = vector.load %arg4[%c0, %c0_0] : memref<8x1xf32, #tpu.memory_space<vmem>>, vector<8x1xf32>
    %c0_1 = arith.constant 0 : index
    %c0_2 = arith.constant 0 : index
    %1 = vector.load %arg3[%c0_1, %c0_2] : memref<8x3xf32, #tpu.memory_space<vmem>>, vector<8x1xf32>
    %c0_3 = arith.constant 0 : index
    %c0_4 = arith.constant 0 : index
    %c0_5 = arith.constant 0 : index
    %2 = vector.load %arg2[%c0_3, %c0_4, %c0_5] : memref<1x3x2304xf32, #tpu.memory_space<vmem>>, vector<1x1x2304xf32>
    %3 = vector.shape_cast %2 : vector<1x1x2304xf32> to vector<1x2304xf32>
    %4 = vector.broadcast %1 : vector<8x1xf32> to vector<8x2304xf32>
    %5 = vector.broadcast %3 : vector<1x2304xf32> to vector<8x2304xf32>
    %6 = arith.mulf %4, %5 : vector<8x2304xf32>
    %7 = vector.broadcast %0 : vector<8x1xf32> to vector<8x2304xf32>
    %8 = arith.addf %7, %6 : vector<8x2304xf32>
    %c0_6 = arith.constant 0 : index
    %c1 = arith.constant 1 : index
    %9 = vector.load %arg3[%c0_6, %c1] : memref<8x3xf32, #tpu.memory_space<vmem>>, vector<8x1xf32>
    %c0_7 = arith.constant 0 : index
    %c1_8 = arith.constant 1 : index
    %c0_9 = arith.constant 0 : index
    %10 = vector.load %arg2[%c0_7, %c1_8, %c0_9] : memref<1x3x2304xf32, #tpu.memory_space<vmem>>, vector<1x1x2304xf32>
    %11 = vector.shape_cast %10 : vector<1x1x2304xf32> to vector<1x2304xf32>
    %12 = vector.broadcast %9 : vector<8x1xf32> to vector<8x2304xf32>
    %13 = vector.broadcast %11 : vector<1x2304xf32> to vector<8x2304xf32>
    %14 = arith.mulf %12, %13 : vector<8x2304xf32>
    %15 = arith.addf %8, %14 : vector<8x2304xf32>
    %c0_10 = arith.constant 0 : index
    %c2 = arith.constant 2 : index
    %16 = vector.load %arg3[%c0_10, %c2] : memref<8x3xf32, #tpu.memory_space<vmem>>, vector<8x1xf32>
    %c0_11 = arith.constant 0 : index
    %c2_12 = arith.constant 2 : index
    %c0_13 = arith.constant 0 : index
    %17 = vector.load %arg2[%c0_11, %c2_12, %c0_13] : memref<1x3x2304xf32, #tpu.memory_space<vmem>>, vector<1x1x2304xf32>
    %18 = vector.shape_cast %17 : vector<1x1x2304xf32> to vector<1x2304xf32>
    %19 = vector.broadcast %16 : vector<8x1xf32> to vector<8x2304xf32>
    %20 = vector.broadcast %18 : vector<1x2304xf32> to vector<8x2304xf32>
    %21 = arith.mulf %19, %20 : vector<8x2304xf32>
    %22 = arith.addf %15, %21 : vector<8x2304xf32>
    %cst = arith.constant 0.000000e+00 : f32
    %23 = vector.broadcast %cst : f32 to vector<8x2304xf32>
    %24 = arith.maximumf %22, %23 : vector<8x2304xf32>
    %c0_14 = arith.constant 0 : index
    %c0_15 = arith.constant 0 : index
    %c0_16 = arith.constant 0 : index
    %25 = vector.load %arg5[%c0_14, %c0_15, %c0_16] : memref<1x8x2304xf32, #tpu.memory_space<vmem>>, vector<1x8x2304xf32>
    %26 = vector.shape_cast %25 : vector<1x8x2304xf32> to vector<8x2304xf32>
    %27 = vector.shape_cast %24 : vector<8x2304xf32> to vector<1x8x2304xf32>
    tpu.vector_store %arg5[%c0_14, %c0_15, %c0_16], %27 {strides = array<i32>} : memref<1x8x2304xf32, #tpu.memory_space<vmem>>, vector<1x8x2304xf32>,
    return
  }
  func.func @transform_0(%arg0: i32, %arg1: i32) -> (i32, i32, i32) {
    %c0_i32 = arith.constant 0 : i32
    %c0_i32_0 = arith.constant 0 : i32
    return %arg0, %c0_i32, %arg1 : i32, i32, i32
  }
  func.func @transform_1(%arg0: i32, %arg1: i32) -> (i32, i32) {
    %c0_i32 = arith.constant 0 : i32
    %c0_i32_0 = arith.constant 0 : i32
    %c0_i32_1 = arith.constant 0 : i32
    return %c0_i32, %c0_i32_0 : i32, i32
  }
  func.func @transform_2(%arg0: i32, %arg1: i32) -> (i32, i32) {
    %c0_i32 = arith.constant 0 : i32
    %c0_i32_0 = arith.constant 0 : i32
    %c0_i32_1 = arith.constant 0 : i32
    return %c0_i32, %c0_i32_0 : i32, i32
  }
  func.func @transform_3(%arg0: i32, %arg1: i32) -> (i32, i32, i32) {
    %c0_i32 = arith.constant 0 : i32
    %c0_i32_0 = arith.constant 0 : i32
    return %arg0, %c0_i32, %arg1 : i32, i32, i32
  }
}

</mosaic_0001>

<bundles_post_ra>
// kernel: tpu_custom_call.1
= control target key start
LH: loop header
LB: loop body
LE: loop exit
PB: predicated region body
PF: predicated region fallthrough
CT: control target
= control target key end

     0   :  { %8 = vsyncpa [#allocation3], 0  ;;  %s1346_s0 = inlined_call_operand.vmem [shape: f32[1,3,4608], index: 0, kind: input, shape index: {}]   ;;  %s1347_s1 = inlined_call_operand.vmem [shape: f32[8,3], index: 1, kind: input, shape index: {}]   ;;  %s1348_s2 = inlined_call_operand.vmem [shape: f32[8,1], index: 2, kind: input, shape index: {}]   ;;  %s1349_s3 = inlined_call_operand.hbm [shape: f32[1,8,4608], index: 3, kind: output, shape index: {}]  }
   0x1   :  { %10 = vsyncpa [#allocation3 + $0x1], 0  ;;  %s938_s12 = smov 0   ;;  %s940_s13 = smov 0  }
   0x2   :  { %s942_s14 = smov 0   ;;  %s944_s15 = smov 0  }
   0x3   :  { %s946_s16 = smov 0   ;;  %s948_s17 = smov 0  }
   0x4 LB: > { %s753_s18 = sadd.s32 4294967295, %s912_s17   ;;  %s754_s19 = sadd.s32 4294967294, %s912_s17   ;;  %s912_s17 = sphi %s948_s17, %s16_s17   ;;  %s908_s16 = sphi %s946_s16, %s1394_s16   ;;  %s904_s15 = sphi %s944_s15, %s1393_s15   ;;  %s900_s14 = sphi %s942_s14, %s1392_s14   ;;  %s896_s13 = sphi %s940_s13, %s1391_s13   ;;  %s892_s12 = sphi %s938_s12, %s1390_s12  }
   0x5   : > { %s25_s20 = sadd.s32 1, %s908_s16  ;;  %s107_s21 = sadd.s32 1, %s900_s14 }
   0x6   : > { %p26_p0 = scmp.ge.s32.totalorder %s25_s20, 2  ;;  %p117_p1 = scmp.ne.s32.totalorder %s900_s14, %s896_s13 }
   0x7   : > { %p118_p2 = scmp.eq.s32.totalorder %s753_s18, 1  ;;  %p123_p3 = scmp.ne.s32.totalorder %s896_s13, %s892_s12 }
   0x8   : > { %s1396_s20 = smov (%p26_p0, %s25_s20), 0  ;;  %p124_p5 = scmp.eq.s32.totalorder %s754_s19, 1 }
   0x9   : > { %p978_p4 = por %p118_p2, %p117_p1  ;;  %s103_s23 = ssub.s32 %s908_s16, %s1396_s20 }
   0xa   : > { %p757_p6 = scmp.ge.s32.totalorder %s912_s17, 1  ;;  %p105_p7 = scmp.eq.s32.totalorder %s103_s23, 0 }
   0xb   : > { %p985_p8 = por %p124_p5, %p123_p3  ;;  %p161_p9 = scmp.lt.s32.totalorder %s912_s17, 3 }
   0xc   : > { %s991_s25 = scalar_select %p105_p7, %s900_s14, %s107_s21  }
   0xd   : > { %p162_p10 = pnand %p757_p6, %p161_p9 }
   0xf   : > { %165 = sbr.rel (%p162_p10) target bundleno = 209 (0xd1), region = 32 }
  0x16   : > { %v201_v0 = vld [vmem:[%s1347_s1] sm:$0xff]  ;;  %v914_v1 = vmov 0   ;;  %v915_v2 = vmov 1   ;;  %v916_v4 = vmov 2   ;;  %s189_s30 = smul.u32 18, %s904_s15  ;;  %v215_v5 = vlaneseq  ;;  %s186_s8 = sand.u32 1, %s896_s13  }
  0x17   : > { %830 = vset.pattern.permute.xlu0 %v914_v1  ;;  %831 = vset.pattern.permute.xlu1 %v915_v2  ;;  %v200_v3 = vld [vmem:[%s1348_s2] sm:$0xff]  ;;  %s1249_s9 = smul.u32 144, %s186_s8  ;;  %s661_s26 = scalar_lea.sflag [#allocation3], %s186_s8 }
  0x18   : > { %209 = vperm.xlu0 %830, %v201_v0   ;;  %353 = vperm.xlu1 %831, %v201_v0   ;;  %p192_p11 = scmp.lt.s32.totalorder %s189_s30, 35  ;;  %v216_v6 = vshrl.u32 %v215_v5, 7  ;;  %s770_s10 = smul.u32 2304, %s904_s15 }
  0x19   : > { %s1271_s11 = scalar_lea.vmem [#allocation2], %s1249_s9  ;;  %s917_s15 = smov [#allocation2]  }
  0x1a   : > { %s1398_s30 = smov (!%p192_p11, %s189_s30), 35  ;;  %v1005_v7 = vsub.s32 0, %v216_v6  ;;  %v1007_v8 = vsub.s32 1, %v216_v6  ;;  %v1009_v9 = vsub.s32 2, %v216_v6  ;;  %v1011_v10 = vsub.s32 3, %v216_v6  ;;  %s677_s18 = sshll.u32 %s1271_s11, 4  ;;  %s1293_s18 = int_to_ptr.vmem [resolvable:$true] %s677_s18 }
  0x1b   : > { %s758_s4 = sshll.u32 %s1398_s30, 2  ;;  %v1013_v11 = vsub.s32 4, %v216_v6  ;;  %v1015_v12 = vsub.s32 5, %v216_v6  ;;  %v1020_v14 = vsub.s32 6, %v216_v6  ;;  %v1022_v15 = vsub.s32 7, %v216_v6  ;;  %s1291_s23 = scalar_lea.hbm %s1349_s3, %s770_s10 }
  0x1c   : > { %325 = vperm.xlu0 %830, %v200_v3   ;;  %832 = vset.pattern.permute.xlu1 %v916_v4  ;;  %s1003_s7 = scalar_lea.vmem %s1346_s0, %s758_s4  ;;  %s834_s27 = scalar_lea.vmem %s1293_s18, 2304 }
  0x1d   : > { %492 = vperm.xlu1 %832, %v201_v0   ;;  %v1018_v13 = vld [vmem:[%s1003_s7] ss:$4 sm:$0xff]  ;;  %1358 = vst [vmem:[#allocation5_spill] sm:$0xff] %v1022_v15  ;;  %v1051_v28 = vld [vmem:[%s1003_s7 + $0x1] ss:$4 sm:$0xff]  ;;  %p835_p12 = scmp.ne.s32.totalorder %s1293_s18, %s834_s27  ;;  %s838_s28 = sshll.u32 %s917_s15, 4  ;;  %s839_s28 = int_to_ptr.vmem [resolvable:$false] %s838_s28 }
  0x1e   : > { %v1025_v16 = vld [vmem:[%s1003_s7 + $0x20] ss:$4 sm:$0xff]  ;;  %v218_v17 = vrot.slane %v1018_v13, %v1005_v7  ;;  %v222_v18 = vrot.slane %v1018_v13, %v1007_v8  ;;  %v226_v20 = vrot.slane %v1018_v13, %v1009_v9  ;;  %v230_v21 = vrot.slane %v1018_v13, %v1011_v10  ;;  %v1070_v37 = vld [vmem:[%s1003_s7 + $0x21] ss:$4 sm:$0xff]  ;;  %v1092_v47 = vld [vmem:[%s1003_s7 + $0x2] ss:$4 sm:$0xff]  ;;  %p841_p1 = scmp.lt.s32.totalorder %s1293_s18, %s839_s28 }
  0x1f   : > { %v1032_v19 = vld [vmem:[%s1003_s7 + $0x40] ss:$4 sm:$0x3]  ;;  %v234_v22 = vrot.slane %v1018_v13, %v1013_v11  ;;  %v238_v23 = vrot.slane %v1018_v13, %v1015_v12  ;;  %v242_v24 = vrot.slane %v1018_v13, %v1020_v14  ;;  %v246_v25 = vrot.slane %v1018_v13, %v1022_v15  ;;  %v1081_v42 = vld [vmem:[%s1003_s7 + $0x41] ss:$4 sm:$0x3]  ;;  %p836_p13 = pnand %p835_p12, %p978_p4 }
  0x20   : > { %833 = vset.pattern.permute.xlu0 %v916_v4  ;;  %v250_v26 = vrot.slane %v1025_v16, %v1005_v7  ;;  %v254_v27 = vrot.slane %v1025_v16, %v1007_v8  ;;  %v258_v29 = vrot.slane %v1025_v16, %v1009_v9  ;;  %v262_v30 = vrot.slane %v1025_v16, %v1011_v10  ;;  %v1111_v56 = vld [vmem:[%s1003_s7 + $0x22] ss:$4 sm:$0xff]  ;;  %s840_s29 = scalar_lea.vmem %s839_s28, 4608 }
  0x21   : > { %v266_v31 = vrot.slane %v1025_v16, %v1013_v11  ;;  %v270_v32 = vrot.slane %v1025_v16, %v1015_v12  ;;  %v274_v33 = vrot.slane %v1025_v16, %v1020_v14  ;;  %v278_v34 = vrot.slane %v1025_v16, %v1022_v15  ;;  %1359 = vst [vmem:[#allocation6_spill] sm:$0xff] %v1111_v56  ;;  %v1122_v61 = vld [vmem:[%s1003_s7 + $0x42] ss:$4 sm:$0x3]  ;;  %p837_p0 = pneg %p836_p13  ;;  %p842_p2 = scmp.lt.s32.totalorder %s840_s29, %s834_s27 }
  0x22   : > { %v282_v35 = vrot.slane %v1032_v19, %v1005_v7  ;;  %v286_v36 = vrot.slane %v1032_v19, %v1007_v8  ;;  %v362_v38 = vrot.slane %v1051_v28, %v1005_v7  ;;  %v366_v39 = vrot.slane %v1051_v28, %v1007_v8  ;;  %1360 = vst [vmem:[#allocation7_spill] sm:$0xff] %v1122_v61 }
  0x23   : > { %v370_v40 = vrot.slane %v1051_v28, %v1009_v9  ;;  %v374_v41 = vrot.slane %v1051_v28, %v1011_v10  ;;  %v378_v43 = vrot.slane %v1051_v28, %v1013_v11  ;;  %v382_v44 = vrot.slane %v1051_v28, %v1015_v12  ;;  %p843_p3 = por %p842_p2, %p841_p1 }
  0x24   : > { %v386_v45 = vrot.slane %v1051_v28, %v1020_v14  ;;  %v390_v46 = vrot.slane %v1051_v28, %v1022_v15  ;;  %v394_v48 = vrot.slane %v1070_v37, %v1005_v7  ;;  %v398_v49 = vrot.slane %v1070_v37, %v1007_v8 }
  0x25   : > { %v1363_v28 = vrot.slane %v1070_v37, %v1013_v11  ;;  %p844_p5 = pnand %p843_p3, %p837_p0 }
  0x97   : > { %v210_v2 = vpop.permute.xlu0 %209 }
  0x98   : > { %v305_v13 = vmul.f32 %v218_v17, %v210_v2  ;;  %v306_v1 = vmul.f32 %v222_v18, %v210_v2  ;;  %v307_v0 = vmul.f32 %v226_v20, %v210_v2  ;;  %v308_v16 = vmul.f32 %v230_v21, %v210_v2 }
  0x99   : > { %v309_v63 = vmul.f32 %v234_v22, %v210_v2  ;;  %v310_v62 = vmul.f32 %v238_v23, %v210_v2  ;;  %v311_v19 = vmul.f32 %v242_v24, %v210_v2  ;;  %v312_v60 = vmul.f32 %v246_v25, %v210_v2  ;;  %v354_v23 = vpop.permute.xlu1 %353 }
  0x9a   : > { %v313_v59 = vmul.f32 %v250_v26, %v210_v2  ;;  %v314_v58 = vmul.f32 %v254_v27, %v210_v2  ;;  %v315_v3 = vmul.f32 %v258_v29, %v210_v2  ;;  %v316_v57 = vmul.f32 %v262_v30, %v210_v2 }
  0x9b   : > { %v326_v55 = vpop.permute.xlu0 %325  ;;  %v317_v4 = vmul.f32 %v266_v31, %v210_v2  ;;  %v318_v54 = vmul.f32 %v270_v32, %v210_v2  ;;  %v319_v53 = vmul.f32 %v274_v33, %v210_v2  ;;  %v320_v5 = vmul.f32 %v278_v34, %v210_v2 }
  0x9c   : > { %v321_v52 = vmul.f32 %v282_v35, %v210_v2  ;;  %v322_v51 = vmul.f32 %v286_v36, %v210_v2  ;;  %v328_v6 = vadd.f32 %v326_v55, %v305_v13  ;;  %v329_v17 = vadd.f32 %v326_v55, %v306_v1 }
  0x9d   : > { %v330_v18 = vadd.f32 %v326_v55, %v307_v0  ;;  %v331_v20 = vadd.f32 %v326_v55, %v308_v16  ;;  %v332_v21 = vadd.f32 %v326_v55, %v309_v63  ;;  %v333_v22 = vadd.f32 %v326_v55, %v310_v62 }
  0x9e   : > { %v334_v24 = vadd.f32 %v326_v55, %v311_v19  ;;  %v335_v25 = vadd.f32 %v326_v55, %v312_v60  ;;  %v336_v26 = vadd.f32 %v326_v55, %v313_v59  ;;  %v337_v27 = vadd.f32 %v326_v55, %v314_v58 }
  0x9f   : > { %v338_v29 = vadd.f32 %v326_v55, %v315_v3  ;;  %v339_v30 = vadd.f32 %v326_v55, %v316_v57  ;;  %v340_v50 = vadd.f32 %v326_v55, %v317_v4  ;;  %v341_v31 = vadd.f32 %v326_v55, %v318_v54 }
  0xa0   : > { %v342_v32 = vadd.f32 %v326_v55, %v319_v53  ;;  %v343_v33 = vadd.f32 %v326_v55, %v320_v5  ;;  %v344_v34 = vadd.f32 %v326_v55, %v321_v52  ;;  %v345_v35 = vadd.f32 %v326_v55, %v322_v51 }
  0xa1   : > { %v449_v36 = vmul.f32 %v362_v38, %v354_v23  ;;  %v450_v62 = vmul.f32 %v366_v39, %v354_v23  ;;  %v451_v58 = vmul.f32 %v370_v40, %v354_v23  ;;  %v452_v54 = vmul.f32 %v374_v41, %v354_v23 }
  0xa2   : > { %v453_v51 = vmul.f32 %v378_v43, %v354_v23  ;;  %v454_v38 = vmul.f32 %v382_v44, %v354_v23  ;;  %v455_v39 = vmul.f32 %v386_v45, %v354_v23  ;;  %v456_v40 = vmul.f32 %v390_v46, %v354_v23 }
  0xa3   : > { %v457_v41 = vmul.f32 %v394_v48, %v354_v23  ;;  %v458_v43 = vmul.f32 %v398_v49, %v354_v23  ;;  %v1361_v52 = vrot.slane %v1070_v37, %v1009_v9  ;;  %v1362_v53 = vrot.slane %v1070_v37, %v1011_v10 }
  0xa4   : > { %v461_v46 = vmul.f32 %v1363_v28, %v354_v23  ;;  %v1364_v55 = vrot.slane %v1070_v37, %v1015_v12  ;;  %v1365_v57 = vrot.slane %v1070_v37, %v1020_v14  ;;  %v1366_v59 = vrot.slane %v1070_v37, %v1022_v15 }
  0xa5   : > { %v459_v44 = vmul.f32 %v1361_v52, %v354_v23  ;;  %v460_v45 = vmul.f32 %v1362_v53, %v354_v23  ;;  %v1367_v63 = vrot.slane %v1081_v42, %v1005_v7  ;;  %v1368_v1 = vrot.slane %v1081_v42, %v1007_v8 }
  0xa6   : > { %v462_v48 = vmul.f32 %v1364_v55, %v354_v23  ;;  %v463_v49 = vmul.f32 %v1365_v57, %v354_v23  ;;  %v464_v60 = vmul.f32 %v1366_v59, %v354_v23  ;;  %v467_v3 = vadd.f32 %v449_v36, %v328_v6  ;;  %v493_v55 = vpop.permute.xlu1 %492 }
  0xa7   : > { %v465_v0 = vmul.f32 %v1367_v63, %v354_v23  ;;  %v466_v2 = vmul.f32 %v1368_v1, %v354_v23  ;;  %v468_v4 = vadd.f32 %v450_v62, %v329_v17  ;;  %v469_v5 = vadd.f32 %v451_v58, %v330_v18 }
  0xa8   : > { %v470_v13 = vadd.f32 %v452_v54, %v331_v20  ;;  %v471_v16 = vadd.f32 %v453_v51, %v332_v21  ;;  %v472_v19 = vadd.f32 %v454_v38, %v333_v22  ;;  %v473_v52 = vadd.f32 %v455_v39, %v334_v24 }
  0xa9   : > { %v474_v53 = vadd.f32 %v456_v40, %v335_v25  ;;  %v475_v28 = vadd.f32 %v457_v41, %v336_v26  ;;  %v476_v37 = vadd.f32 %v458_v43, %v337_v27  ;;  %v477_v57 = vadd.f32 %v459_v44, %v338_v29 }
  0xaa   : > { %v478_v59 = vadd.f32 %v460_v45, %v339_v30  ;;  %v479_v61 = vadd.f32 %v461_v46, %v340_v50  ;;  %v480_v63 = vadd.f32 %v462_v48, %v341_v31  ;;  %v481_v56 = vadd.f32 %v463_v49, %v342_v32  ;;  %v1376_v32 = vld [vmem:[#allocation5_spill] sm:$0xff]  ;;  %v1387_v48 = vld [vmem:[#allocation7_spill] sm:$0xff] }
  0xab   : > { %v482_v15 = vadd.f32 %v464_v60, %v343_v33  ;;  %v483_v42 = vadd.f32 %v465_v0, %v344_v34  ;;  %v484_v6 = vadd.f32 %v466_v2, %v345_v35  ;;  %v1369_v17 = vrot.slane %v1092_v47, %v1005_v7  ;;  %v1378_v35 = vld [vmem:[#allocation6_spill] sm:$0xff] }
  0xac   : > { %v1370_v20 = vrot.slane %v1092_v47, %v1007_v8  ;;  %v1371_v22 = vrot.slane %v1092_v47, %v1009_v9  ;;  %v1372_v50 = vrot.slane %v1092_v47, %v1011_v10  ;;  %v1373_v25 = vrot.slane %v1092_v47, %v1013_v11 }
  0xad   : > { %v588_v18 = vmul.f32 %v1369_v17, %v493_v55  ;;  %v1374_v27 = vrot.slane %v1092_v47, %v1015_v12  ;;  %v1375_v30 = vrot.slane %v1092_v47, %v1020_v14  ;;  %v1377_v33 = vrot.slane %v1092_v47, %v1376_v32 }
  0xae   : > { %v589_v21 = vmul.f32 %v1370_v20, %v493_v55  ;;  %v590_v23 = vmul.f32 %v1371_v22, %v493_v55  ;;  %v591_v24 = vmul.f32 %v1372_v50, %v493_v55  ;;  %v592_v26 = vmul.f32 %v1373_v25, %v493_v55 }
  0xaf   : > { %v593_v29 = vmul.f32 %v1374_v27, %v493_v55  ;;  %v594_v31 = vmul.f32 %v1375_v30, %v493_v55  ;;  %v595_v34 = vmul.f32 %v1377_v33, %v493_v55  ;;  %v1379_v36 = vrot.slane %v1378_v35, %v1005_v7 }
  0xb0   : > { %v1380_v58 = vrot.slane %v1378_v35, %v1007_v8  ;;  %v1381_v51 = vrot.slane %v1378_v35, %v1009_v9  ;;  %v1382_v39 = vrot.slane %v1378_v35, %v1011_v10  ;;  %v1383_v47 = vrot.slane %v1378_v35, %v1013_v11 }
  0xb1   : > { %v596_v62 = vmul.f32 %v1379_v36, %v493_v55  ;;  %v1384_v43 = vrot.slane %v1378_v35, %v1015_v12  ;;  %v1385_v45 = vrot.slane %v1378_v35, %v1020_v14  ;;  %v1386_v46 = vrot.slane %v1378_v35, %v1376_v32 }
  0xb2   : > { %v597_v54 = vmul.f32 %v1380_v58, %v493_v55  ;;  %v598_v38 = vmul.f32 %v1381_v51, %v493_v55  ;;  %v599_v40 = vmul.f32 %v1382_v39, %v493_v55  ;;  %v600_v41 = vmul.f32 %v1383_v47, %v493_v55 }
  0xb3   : > { %v601_v44 = vmul.f32 %v1384_v43, %v493_v55  ;;  %v602_v9 = vmul.f32 %v1385_v45, %v493_v55  ;;  %v603_v10 = vmul.f32 %v1386_v46, %v493_v55  ;;  %v1388_v49 = vrot.slane %v1387_v48, %v1005_v7 }
  0xb4   : > { %v1389_v11 = vrot.slane %v1387_v48, %v1007_v8  ;;  %v606_v1 = vadd.f32 %v588_v18, %v467_v3  ;;  %v607_v2 = vadd.f32 %v589_v21, %v468_v4  ;;  %v608_v12 = vadd.f32 %v590_v23, %v469_v5 }
  0xb5   : > { %v604_v60 = vmul.f32 %v1388_v49, %v493_v55  ;;  %v609_v17 = vadd.f32 %v591_v24, %v470_v13  ;;  %v610_v20 = vadd.f32 %v592_v26, %v471_v16  ;;  %v611_v22 = vadd.f32 %v593_v29, %v472_v19 }
  0xb6   : > { %v605_v0 = vmul.f32 %v1389_v11, %v493_v55  ;;  %v612_v14 = vadd.f32 %v594_v31, %v473_v52  ;;  %v613_v50 = vadd.f32 %v595_v34, %v474_v53  ;;  %v614_v25 = vadd.f32 %v596_v62, %v475_v28 }
  0xb7   : > { %v615_v27 = vadd.f32 %v597_v54, %v476_v37  ;;  %v616_v30 = vadd.f32 %v598_v38, %v477_v57  ;;  %v617_v32 = vadd.f32 %v599_v40, %v478_v59  ;;  %v618_v7 = vadd.f32 %v600_v41, %v479_v61 }
  0xb8   : > { %v619_v33 = vadd.f32 %v601_v44, %v480_v63  ;;  %v620_v35 = vadd.f32 %v602_v9, %v481_v56  ;;  %v621_v36 = vadd.f32 %v603_v10, %v482_v15  ;;  %v622_v8 = vadd.f32 %v604_v60, %v483_v42 }
  0xb9   : > { %v623_v55 = vadd.f32 %v605_v0, %v484_v6  ;;  %v624_v3 = vmax.f32 %v606_v1, 0.0  ;;  %v625_v4 = vmax.f32 %v607_v2, 0.0  ;;  %v626_v5 = vmax.f32 %v608_v12, 0.0 }
  0xba   : > { %v627_v13 = vmax.f32 %v609_v17, 0.0  ;;  %v628_v16 = vmax.f32 %v610_v20, 0.0  ;;  %v629_v19 = vmax.f32 %v611_v22, 0.0  ;;  %v630_v52 = vmax.f32 %v612_v14, 0.0 }
  0xbb   : > { %v631_v53 = vmax.f32 %v613_v50, 0.0  ;;  %v632_v15 = vmax.f32 %v614_v25, 0.0  ;;  %v633_v56 = vmax.f32 %v615_v27, 0.0  ;;  %v634_v61 = vmax.f32 %v616_v30, 0.0  ;;  %642 = vst [vmem:[%s1271_s11] sm:$0xff] %v624_v3  ;;  %643 = vst [vmem:[%s1271_s11 + $0x8] sm:$0xff] %v625_v4 }
  0xbc   : > { %v635_v28 = vmax.f32 %v617_v32, 0.0  ;;  %644 = vst [vmem:[%s1271_s11 + $0x10] sm:$0xff] %v626_v5  ;;  %645 = vst [vmem:[%s1271_s11 + $0x18] sm:$0xff] %v627_v13  ;;  %v636_v37 = vmax.f32 %v618_v7, 0.0  ;;  %v637_v57 = vmax.f32 %v619_v33, 0.0  ;;  %v638_v59 = vmax.f32 %v620_v35, 0.0 }
  0xbd   : > { %v639_v63 = vmax.f32 %v621_v36, 0.0  ;;  %646 = vst [vmem:[%s1271_s11 + $0x20] sm:$0xff] %v628_v16  ;;  %647 = vst [vmem:[%s1271_s11 + $0x28] sm:$0xff] %v629_v19  ;;  %v640_v42 = vmax.f32 %v622_v8, 0.0  ;;  %v641_v6 = vmax.f32 %v623_v55, 0.0 }
  0xbe   : > { %648 = vst [vmem:[%s1271_s11 + $0x30] sm:$0xff] %v630_v52  ;;  %649 = vst [vmem:[%s1271_s11 + $0x38] sm:$0xff] %v631_v53 }
  0xbf   : > { %650 = vst [vmem:[%s1271_s11 + $0x40] sm:$0xff] %v632_v15  ;;  %651 = vst [vmem:[%s1271_s11 + $0x48] sm:$0xff] %v633_v56 }
  0xc0   : > { %652 = vst [vmem:[%s1271_s11 + $0x50] sm:$0xff] %v634_v61  ;;  %653 = vst [vmem:[%s1271_s11 + $0x58] sm:$0xff] %v635_v28 }
  0xc1   : > { %654 = vst [vmem:[%s1271_s11 + $0x60] sm:$0xff] %v636_v37  ;;  %655 = vst [vmem:[%s1271_s11 + $0x68] sm:$0xff] %v637_v57 }
  0xc2   : > { %656 = vst [vmem:[%s1271_s11 + $0x70] sm:$0xff] %v638_v59  ;;  %657 = vst [vmem:[%s1271_s11 + $0x78] sm:$0xff] %v639_v63 }
  0xc3   : > { %658 = vst [vmem:[%s1271_s11 + $0x80] sm:$0xff] %v640_v42  ;;  %659 = vst [vmem:[%s1271_s11 + $0x88] sm:$0xff] %v641_v6 }
  0xc4   : > { %847 = shalt.err (!%p844_p5)
}
  0xc5   : > { %s848_s30 = scalar_lea.hbm %s1291_s23, 2304  ;;  %s852_s6 = scalar_lea.hbm %s1349_s3, 4608 }
  0xc6   : > { %p849_p6 = scmp.ne.s32.totalorder %s1291_s23, %s848_s30  ;;  %p853_p10 = scmp.lt.u32.totalorder %s1291_s23, %s1349_s3 }
  0xc7   : > { %p854_p11 = scmp.lt.u32.totalorder %s852_s6, %s848_s30  ;;  %p856_p13 = scmp.lt.u32.totalorder %s848_s30, %s1291_s23 }
  0xc8   : > { %p850_p7 = pnand %p849_p6, %p978_p4 }
  0xc9   : > { %p855_p12 = por %p854_p11, %p853_p10 }
  0xca   : > { %p851_p9 = pneg %p850_p7 }
  0xcb   : > { %p857_p0 = por %p856_p13, %p855_p12 }
  0xcd   : > { %p858_p1 = pnand %p857_p0, %p851_p9 }
  0xcf   : > { %861 = shalt.err (!%p858_p1)
}
  0xd0   : > { %772 = dma.vmem_to_hbm [thread:$0]  (%p978_p4), %s1293_s18, 2304, %s1291_s23, %s661_s26  }
  0xd1 PF: > { %p778_p2 = scmp.ge.s32.totalorder %s912_s17, 2  ;;  %s689_s9 = sand.u32 1, %s892_s12  }
  0xd2   : > { %s690_s10 = scalar_lea.sflag [#allocation3], %s689_s9 }
  0xd3   : > { %p775_p3 = pnand %p778_p2, %p985_p8 }
  0xd5   : > { %887 = dma.done.wait (!%p775_p3), %s690_s10, 2304  }
  0xd6   : > { %889 = vsyncadd (!%p775_p3), %s690_s10, 4294964992  ;;  %s16_s17 = sadd.s32 1, %s912_s17   ;;  %s1390_s12 = smov %s896_s13 }
  0xd7   : > { %p13_p5 = scmp.ge.s32.totalorder %s16_s17, 4   ;;  %s1391_s13 = smov %s900_s14 }
  0xd8   : > { %s1392_s14 = smov %s991_s25  ;;  %s1393_s15 = smov %s908_s16 }
  0xd9   : > { %s1394_s16 = smov %s1396_s20  ;;  %15 = sbr.rel (!%p13_p5) target bundleno = 4 (0x4), region = 75 }
  0xe0   :  { %695 = vsyncpa [#allocation3], 1 }
  0xe1   :  { %697 = vsyncpa [#allocation3 + $0x1], 1 }

</bundles_post_ra>
